<compile_context>
chip_gen: v7x
topology: tpu7x:2x2x1
jax: 0.10.0
libtpu: 0.0.40
codegen_flags: <defaults>
</compile_context>

<pallas_src>
import functools

import jax
import jax.numpy as jnp
from jax.experimental import pallas as pl
from jax.experimental.pallas import tpu as pltpu


def _round_up(x, m):
    return ((x + m - 1) // m) * m


def alpha_loss_ref(log_ps, vs, target_ps, target_vs):
    """Pure-JAX reference (and tiny-size fallback)."""
    vs = vs.reshape(-1).astype(jnp.float32)
    target_vs = target_vs.reshape(-1).astype(jnp.float32)
    log_ps = log_ps.astype(jnp.float32)
    target_ps = target_ps.astype(jnp.float32)
    value_loss = jnp.mean((vs - target_vs) ** 2)
    policy_loss = -jnp.mean(jnp.sum(target_ps * log_ps, axis=1))
    return value_loss + policy_loss


def _policy_partial_kernel(logp_ref, tp_ref, out_ref, *, batch, tile_b):
    """One batch tile -> one f32 partial sum of target_ps * log_ps.

    The partial is broadcast into an (8,128)-aligned output slab (lane- and
    sublane-dense, so the store is a plain unmasked vst); the wrapper reads
    element [0, 0] of each slab and tree-sums the per-tile partials.
    """
    i = pl.program_id(0)
    lp = logp_ref[...].astype(jnp.float32)
    tp = tp_ref[...].astype(jnp.float32)
    prod = lp * tp

    # Batch remainder: mask rows past the true batch (last partial tile reads
    # unspecified data beyond the array bound).  Static no-op when tb | batch.
    if batch % tile_b != 0:
        row = jax.lax.broadcasted_iota(jnp.int32, prod.shape, 0) + i * tile_b
        prod = jnp.where(row < batch, prod, 0.0)

    partial = jnp.sum(prod)                      # f32 tile-local reduce
    out_ref[...] = jnp.broadcast_to(partial, out_ref.shape)


def _choose_batch_tile(batch, actions, itemsize, tile_b=None):
    """Rows per tile, sized by bytes (not by a row cap)."""
    if batch <= 8:
        return batch                             # full-extent block is legal
    if tile_b is not None:
        tb = int(tile_b)
    else:
        # ~6 MiB per block: 2 policy inputs x 2 pipeline buffers -> ~24-28 MiB,
        # safe under a 48 MiB scoped-VMEM limit on v5e/v6e and v7x (64 MiB).
        budget_per_block = 6 * 1024 * 1024
        lane_bytes = _round_up(actions, 128) * itemsize   # VMEM lane padding
        tb = budget_per_block // max(1, lane_bytes)
    tb = min(tb, _round_up(batch, 8))
    tb = max(8, (int(tb) // 8) * 8)
    return tb


def alpha_loss(log_ps, vs, target_ps, target_vs, *,
               tile_b=None, force_pallas=False):
    """log_ps, target_ps: [B, A]; vs, target_vs: [B] or [B, 1]. Returns f32 scalar."""
    log_ps = jnp.asarray(log_ps)
    target_ps = jnp.asarray(target_ps)
    vs = jnp.asarray(vs).reshape(-1)
    target_vs = jnp.asarray(target_vs).reshape(-1)
    batch, actions = log_ps.shape

    # Tiny problems: a single fused XLA reduction beats the fixed pallas_call
    # overhead; keep the kernel path for training-scale batches.
    if not force_pallas and batch * actions < 16384:
        return alpha_loss_ref(log_ps, vs, target_ps, target_vs)

    # Value MSE term: O(B) elementwise work on lane-sparse [B] streams -- do it
    # with plain jnp in the wrapper instead of extra tiny per-step DMAs.
    dv = vs.astype(jnp.float32) - target_vs.astype(jnp.float32)
    value_loss = jnp.mean(dv * dv)

    itemsize = jnp.dtype(log_ps.dtype).itemsize
    tb = _choose_batch_tile(batch, actions, itemsize, tile_b)
    n_tiles = (batch + tb - 1) // tb

    kernel = functools.partial(_policy_partial_kernel, batch=batch, tile_b=tb)

    cost = pl.CostEstimate(
        flops=2 * batch * actions,
        transcendentals=0,
        bytes_accessed=2 * batch * actions * itemsize + n_tiles * 8 * 128 * 4,
    )

    partial_slabs = pl.pallas_call(
        kernel,
        out_shape=jax.ShapeDtypeStruct((n_tiles, 8, 128), jnp.float32),
        grid=(n_tiles,),
        in_specs=[
            # Action dim as a full-extent block (no 128-padding of A needed);
            # batch dim tiled in multiples of 8 rows.
            pl.BlockSpec((tb, actions), lambda i: (i, 0)),   # log_ps tile
            pl.BlockSpec((tb, actions), lambda i: (i, 0)),   # target_ps tile
        ],
        # One independent (8,128)-aligned slab per tile -> no carried state,
        # so the batch-tile axis can be sharded across v7x's two TensorCores.
        out_specs=pl.BlockSpec((1, 8, 128), lambda i: (i, 0, 0)),
        compiler_params=pltpu.CompilerParams(
            dimension_semantics=("parallel",),
            vmem_limit_bytes=48 * 1024 * 1024,
        ),
        cost_estimate=cost,
    )(log_ps, target_ps)

    policy_sum = jnp.sum(partial_slabs[:, 0, 0])
    policy_loss = -policy_sum / jnp.float32(batch)
    return value_loss + policy_loss


if __name__ == "__main__":
    key = jax.random.PRNGKey(0)
    k1, k2, k3, k4 = jax.random.split(key, 4)

    # Small shapes consistent with the module: batch=8, action space=64.
    B, A = 8, 64
    logits = jax.random.normal(k1, (B, A), jnp.float32)
    log_ps = jax.nn.log_softmax(logits, axis=1)              # network log-probs
    target_ps = jax.nn.softmax(jax.random.normal(k2, (B, A), jnp.float32), axis=1)
    vs = jnp.tanh(jax.random.normal(k3, (B,), jnp.float32))  # predicted winner
    target_vs = jnp.sign(jax.random.normal(k4, (B,), jnp.float32))  # self-play winner

    loss = alpha_loss(log_ps, vs, target_ps, target_vs, force_pallas=True)
    loss = jax.block_until_ready(loss)
    ref = alpha_loss_ref(log_ps, vs, target_ps, target_vs)
    assert jnp.allclose(loss, ref, rtol=1e-5, atol=1e-5), (loss, ref)

    # Second config: gomoku-sized action space (15x15=225, NOT padded to 256),
    # batch remainder masking (300 rows, tile 128 -> 3 tiles, last one ragged).
    B2, A2 = 300, 225
    kk = jax.random.split(jax.random.PRNGKey(0), 4)
    log_ps2 = jax.nn.log_softmax(
        jax.random.normal(kk[0], (B2, A2), jnp.float32), axis=1)
    target_ps2 = jax.nn.softmax(
        jax.random.normal(kk[1], (B2, A2), jnp.float32), axis=1)
    vs2 = jnp.tanh(jax.random.normal(kk[2], (B2,), jnp.float32))
    target_vs2 = jnp.sign(jax.random.normal(kk[3], (B2,), jnp.float32))

    loss2 = alpha_loss(log_ps2, vs2, target_ps2, target_vs2,
                       tile_b=128, force_pallas=True)
    loss2 = jax.block_until_ready(loss2)
    ref2 = alpha_loss_ref(log_ps2, vs2, target_ps2, target_vs2)
    assert jnp.allclose(loss2, ref2, rtol=1e-5, atol=1e-5), (loss2, ref2)

    # Third config: default byte-budget tile sizing (single ragged tile) plus
    # bf16 policy inputs (halved HBM bytes, f32 in-kernel accumulation).
    loss3 = alpha_loss(log_ps2.astype(jnp.bfloat16), vs2,
                       target_ps2.astype(jnp.bfloat16), target_vs2,
                       force_pallas=True)
    loss3 = jax.block_until_ready(loss3)
    ref3 = alpha_loss_ref(log_ps2.astype(jnp.bfloat16), vs2,
                          target_ps2.astype(jnp.bfloat16), target_vs2)
    assert jnp.allclose(loss3, ref3, rtol=1e-3, atol=1e-3), (loss3, ref3)

    print("KERNEL_OK")
</pallas_src>

<mosaic_0001>
module attributes {stable_mosaic.version = 11 : i64} {
  func.func @_policy_partial_kernel(%arg0: i32, %arg1: memref<8x64xf32, #tpu.memory_space<vmem>>, %arg2: memref<8x64xf32, #tpu.memory_space<vmem>>, %arg3: memref<1x8x128xf32, #tpu.memory_space<vmem>>) attributes {dimension_semantics = [#tpu.dimension_semantics<parallel>], iteration_bounds = array<i64: 1>, scalar_prefetch = 0 : i64, scratch_operands = 0 : i64, tpu.core_type = #tpu.core_type<tc>, window_params = [{transform_indices = @transform_0, window_bounds = array<i64: 8, 64>}, {transform_indices = @transform_1, window_bounds = array<i64: 8, 64>}, {transform_indices = @transform_2, window_bounds = array<i64: 1, 8, 128>}]} {
    %c0 = arith.constant 0 : index
    %c0_0 = arith.constant 0 : index
    %0 = vector.load %arg1[%c0, %c0_0] : memref<8x64xf32, #tpu.memory_space<vmem>>, vector<8x64xf32>
    %c0_1 = arith.constant 0 : index
    %c0_2 = arith.constant 0 : index
    %1 = vector.load %arg2[%c0_1, %c0_2] : memref<8x64xf32, #tpu.memory_space<vmem>>, vector<8x64xf32>
    %2 = arith.mulf %0, %1 : vector<8x64xf32>
    %3 = vector.shape_cast %2 : vector<8x64xf32> to vector<1x8x64xf32>
    %cst = arith.constant dense<0.000000e+00> : vector<1xf32>
    %4 = vector.multi_reduction <add>, %3, %cst [1, 2] : vector<1x8x64xf32> to vector<1xf32>
    %5 = vector.shape_cast %4 : vector<1xf32> to vector<1x1x1xf32>
    %6 = vector.extract %5[0, 0, 0] : f32 from vector<1x1x1xf32>
    %7 = vector.broadcast %6 : f32 to vector<1x8x128xf32>
    %c0_3 = arith.constant 0 : index
    %c0_4 = arith.constant 0 : index
    %c0_5 = arith.constant 0 : index
    %8 = vector.load %arg3[%c0_3, %c0_4, %c0_5] : memref<1x8x128xf32, #tpu.memory_space<vmem>>, vector<1x8x128xf32>
    tpu.vector_store %arg3[%c0_3, %c0_4, %c0_5], %7 {strides = array<i32>} : memref<1x8x128xf32, #tpu.memory_space<vmem>>, vector<1x8x128xf32>,
    return
  }
  func.func @transform_0(%arg0: i32) -> (i32, i32) {
    %c0_i32 = arith.constant 0 : i32
    %c0_i32_0 = arith.constant 0 : i32
    return %arg0, %c0_i32 : i32, i32
  }
  func.func @transform_1(%arg0: i32) -> (i32, i32) {
    %c0_i32 = arith.constant 0 : i32
    %c0_i32_0 = arith.constant 0 : i32
    return %arg0, %c0_i32 : i32, i32
  }
  func.func @transform_2(%arg0: i32) -> (i32, i32, i32) {
    %c0_i32 = arith.constant 0 : i32
    %c0_i32_0 = arith.constant 0 : i32
    %c0_i32_1 = arith.constant 0 : i32
    return %arg0, %c0_i32, %c0_i32_0 : i32, i32, i32
  }
}

</mosaic_0001>

<bundles_post_ra>
// kernel: tpu_custom_call.1
= control target key start
LH: loop header
LB: loop body
LE: loop exit
PB: predicated region body
PF: predicated region fallthrough
CT: control target
= control target key end

     0   :  { %7 = vsyncpa [#allocation3], 0  ;;  %s199_s0 = inlined_call_operand.hbm [shape: f32[8,64], index: 0, kind: input, shape index: {}]   ;;  %s200_s1 = inlined_call_operand.hbm [shape: f32[8,64], index: 1, kind: input, shape index: {}]   ;;  %s201_s2 = inlined_call_operand.hbm [shape: f32[1,8,128], index: 2, kind: output, shape index: {}]  }
   0x1   :  { %8 = vsyncpa [#allocation6], 0 }
   0x2   :  { %9 = vsyncpa [#allocation4], 0  ;;  %s145_s9 = smov [#allocation2]   ;;  %s146_s11 = smov [#allocation5]  }
   0x3   :  { %s16_s10 = sshll.u32 %s145_s9, 4  ;;  %s26_s12 = sshll.u32 %s146_s11, 4  ;;  %s17_s10 = int_to_ptr.vmem [resolvable:$true] %s16_s10  ;;  %s27_s12 = int_to_ptr.vmem [resolvable:$true] %s26_s12 }
   0x4   :  { %s73_s15 = scalar_lea.hbm %s199_s0, 128 }
   0x5   :  { %p74_p0 = scmp.ne.s32.totalorder %s199_s0, %s73_s15  ;;  %p77_p1 = scmp.lt.u32.totalorder %s73_s15, %s199_s0 }
   0x7   :  { %p79_p2 = pnand %p77_p1, %p74_p0 }
   0x9   :  { %82 = shalt.err (!%p79_p2)
}
   0xa   :  { %s83_s20 = scalar_lea.vmem %s17_s10, 128  ;;  %p88_p4 = scmp.lt.s32.totalorder %s17_s10, %s17_s10 }
   0xb   :  { %p84_p3 = scmp.ne.s32.totalorder %s17_s10, %s83_s20  ;;  %p89_p5 = scmp.lt.s32.totalorder %s83_s20, %s83_s20 }
   0xd   :  { %p90_p6 = por %p89_p5, %p88_p4 }
   0xf   :  { %p91_p7 = pnand %p90_p6, %p84_p3 }
  0x11   :  { %94 = shalt.err (!%p91_p7)
}
  0x12   :  { %19 = dma.hbm_to_vmem [thread:$0]  %s199_s0, 128, %s17_s10, [#allocation3]  }
  0x13   :  { %s95_s25 = scalar_lea.hbm %s200_s1, 128 }
  0x14   :  { %p96_p8 = scmp.ne.s32.totalorder %s200_s1, %s95_s25  ;;  %p99_p9 = scmp.lt.u32.totalorder %s95_s25, %s200_s1 }
  0x16   :  { %p101_p10 = pnand %p99_p9, %p96_p8 }
  0x18   :  { %104 = shalt.err (!%p101_p10)
}
  0x19   :  { %s105_s30 = scalar_lea.vmem %s27_s12, 128  ;;  %p110_p12 = scmp.lt.s32.totalorder %s27_s12, %s27_s12 }
  0x1a   :  { %p106_p11 = scmp.ne.s32.totalorder %s27_s12, %s105_s30  ;;  %p111_p13 = scmp.lt.s32.totalorder %s105_s30, %s105_s30 }
  0x1c   :  { %p112_p0 = por %p111_p13, %p110_p12 }
  0x1e   :  { %p113_p1 = pnand %p112_p0, %p106_p11 }
  0x20   :  { %116 = shalt.err (!%p113_p1)
}
  0x21   :  { %29 = dma.hbm_to_vmem [thread:$0]  %s200_s1, 128, %s27_s12, [#allocation6]  }
  0x22   :  { %139 = dma.done.wait [#allocation3], 128  }
  0x23   :  { %140 = vsyncadd [#allocation3], 4294967168 }
  0x24   :  { %141 = dma.done.wait [#allocation6], 128  }
  0x25   :  { %142 = vsyncadd [#allocation6], 4294967168  ;;  %v36_v0 = vld [vmem:[#allocation2] sm:$0xff]  ;;  %v37_v1 = vld [vmem:[#allocation5] sm:$0xff]  ;;  %vm39_vm0 = vcmask 523264   ;;  %s147_s4 = smov [#allocation7]  }
  0x26   :  { %v38_v2 = vmul.f32 %v37_v1, %v36_v0  ;;  %s58_s1 = sshll.u32 %s147_s4, 4  ;;  %s59_s1 = int_to_ptr.vmem [resolvable:$true] %s58_s1 }
  0x27   :  { %s117_s6 = scalar_lea.vmem %s59_s1, 128  ;;  %p122_p3 = scmp.lt.s32.totalorder %s59_s1, %s59_s1 }
  0x28   :  { %v40_v3 = vsel %vm39_vm0, %v38_v2, 0.0  ;;  %p118_p2 = scmp.ne.s32.totalorder %s59_s1, %s117_s6  ;;  %p123_p4 = scmp.lt.s32.totalorder %s117_s6, %s117_s6 }
  0x29   :  { %41 = vadd.xlane.f32.xlu0 %v40_v3 }
  0x2a   :  { %p124_p5 = por %p123_p4, %p122_p3 }
  0x2c   :  { %p125_p6 = pnand %p124_p5, %p118_p2 }
  0xb6   :  { %v42_v4 = vpop.xlane.xlu0 %41 }
  0xb7   :  { %v43_v5 = vrot.slane %v42_v4, 4 }
  0xb9   :  { %v44_v6 = vadd.f32 %v43_v5, %v42_v4 }
  0xbb   :  { %v45_v7 = vrot.slane %v44_v6, 2 }
  0xbd   :  { %v46_v8 = vadd.f32 %v45_v7, %v44_v6 }
  0xbf   :  { %v47_v9 = vrot.slane %v46_v8, 1 }
  0xc1   :  { %v48_v10 = vadd.f32 %v47_v9, %v46_v8 }
  0xc3   :  { %68 = vpush %v48_v10 }
  0xf4   :  { %s69_s5 = spop %68 }
  0xf5   :  { %v50_v11 = vstv %s69_s5 }
  0xf6   :  { %51 = vst [vmem:[#allocation7] sm:$0xff] %v50_v11 }
  0xf7   :  { %128 = shalt.err (!%p125_p6)
}
  0xf8   :  { %s129_s9 = scalar_lea.hbm %s201_s2, 128 }
  0xf9   :  { %p130_p7 = scmp.ne.s32.totalorder %s201_s2, %s129_s9  ;;  %p133_p8 = scmp.lt.u32.totalorder %s129_s9, %s201_s2 }
  0xfb   :  { %p135_p9 = pnand %p133_p8, %p130_p7 }
  0xfd   :  { %138 = shalt.err (!%p135_p9)
}
  0xfe   :  { %61 = dma.vmem_to_hbm [thread:$0]  %s59_s1, 128, %s201_s2, [#allocation4]  }
  0xff   :  { %143 = dma.done.wait [#allocation4], 128  }
 0x100   :  { %144 = vsyncadd [#allocation4], 4294967168 }
 0x101   :  { %65 = vsyncpa [#allocation3], 1 }
 0x102   :  { %66 = vsyncpa [#allocation6], 1 }
 0x103   :  { %67 = vsyncpa [#allocation4], 1 }

</bundles_post_ra>
